<compile_context>
chip_gen: v5e
topology: v5e:2x2
jax: 0.10.0
libtpu: 0.0.40
codegen_flags: <defaults>
</compile_context>

<pallas_src>
import functools

import jax
import jax.numpy as jnp
from jax.experimental import pallas as pl
from jax.experimental.pallas import tpu as pltpu


def _round_up(x, m):
    return ((x + m - 1) // m) * m


def _batch_tiling(B, block_batch):
    """Evenly sized batch tiles; waste bounded to <8 rows per tile."""
    num_tiles = pl.cdiv(B, block_batch)
    # For big batches make sure the grid has >= 2 steps so the "parallel"
    # batch axis can shard across both TensorCores on v7x.
    if B >= 512 and num_tiles < 2:
        num_tiles = 2
    tb = _round_up(pl.cdiv(B, num_tiles), 8)
    b_pad = num_tiles * tb
    return tb, b_pad, num_tiles


def _actor_kernel(max_action, action_dim, act_dtype):
    """Kernel body closing over static max_action / action_dim / epilogue dtype."""

    def kernel(state_ref, w1_ref, b1_ref, w2_ref, b2_ref, w3_ref, b3_ref, out_ref):
        x = state_ref[...].astype(jnp.bfloat16)                    # (TB, S)

        # layer 1: Linear(state_dim, 400) + ReLU  (bf16 MXU, f32 accum)
        h1 = jnp.dot(x, w1_ref[...], preferred_element_type=jnp.float32)
        h1 = jnp.maximum(h1.astype(act_dtype) + b1_ref[...], 0.0)  # (TB, 512)

        # layer 2: Linear(400, 300) + ReLU
        h2 = jnp.dot(h1.astype(jnp.bfloat16), w2_ref[...],
                     preferred_element_type=jnp.float32)
        h2 = jnp.maximum(h2.astype(act_dtype) + b2_ref[...], 0.0)  # (TB, 384)

        # layer 3: Linear(300, action_dim) + tanh * max_action (f32 epilogue)
        y = jnp.dot(h2.astype(jnp.bfloat16), w3_ref[...],
                    preferred_element_type=jnp.float32)
        y = jnp.tanh(y + b3_ref[...]) * max_action                 # (TB, 128) f32

        # Store only the real action lanes (narrow output, masked vst).
        out_ref[...] = y[:, :action_dim].astype(out_ref.dtype)

    return kernel


def default_epilogue_dtype():
    """bf16 epilogue on chips with bf16 VALUs (v6e/v7x), f32 otherwise (v5e)."""
    try:
        kind = jax.devices()[0].device_kind.lower()
    except Exception:
        return jnp.float32
    if "v6" in kind or "v7" in kind:
        return jnp.bfloat16
    return jnp.float32


def init_actor_params(key, state_dim, action_dim):
    """Deterministic init matching the PyTorch layer shapes.

    nn.Linear(in, out) has weight (out, in); we store the transpose (in, out)
    so the kernel does x @ W. Uniform(-1/sqrt(in), 1/sqrt(in)) like PyTorch.
    """
    def linear(k, fan_in, fan_out):
        kw, kb = jax.random.split(k)
        bound = 1.0 / jnp.sqrt(fan_in)
        w = jax.random.uniform(kw, (fan_in, fan_out), jnp.float32, -bound, bound)
        b = jax.random.uniform(kb, (1, fan_out), jnp.float32, -bound, bound)
        return w, b

    k1, k2, k3 = jax.random.split(key, 3)
    w1, b1 = linear(k1, state_dim, 400)
    w2, b2 = linear(k2, 400, 300)
    w3, b3 = linear(k3, 300, action_dim)
    return (w1, b1, w2, b2, w3, b3)


def prepare_actor_params(params, act_dtype=jnp.float32):
    """Zero-pad lane dims to multiples of 128, weights -> bf16, b1/b2 -> act_dtype."""
    w1, b1, w2, b2, w3, b3 = params
    h1, h2, a = w1.shape[1], w2.shape[1], w3.shape[1]
    h1p, h2p, ap = _round_up(h1, 128), _round_up(h2, 128), _round_up(a, 128)

    w1p = jnp.pad(w1, ((0, 0), (0, h1p - h1))).astype(jnp.bfloat16)
    b1p = jnp.pad(b1, ((0, 0), (0, h1p - h1))).astype(act_dtype)
    w2p = jnp.pad(w2, ((0, h1p - h1), (0, h2p - h2))).astype(jnp.bfloat16)
    b2p = jnp.pad(b2, ((0, 0), (0, h2p - h2))).astype(act_dtype)
    w3p = jnp.pad(w3, ((0, h2p - h2), (0, ap - a))).astype(jnp.bfloat16)
    b3p = jnp.pad(b3, ((0, 0), (0, ap - a)))                      # stays f32
    return (w1p, b1p, w2p, b2p, w3p, b3p), a


@functools.partial(jax.jit, static_argnames=("action_dim", "max_action", "block_batch"))
def actor_forward(state, kernel_params, action_dim, max_action, block_batch=1024):
    """Fused Actor forward. state: (B, state_dim) f32 -> (B, action_dim) f32."""
    w1, b1, w2, b2, w3, b3 = kernel_params
    B, S = state.shape
    act_dtype = jnp.dtype(b1.dtype)            # epilogue dtype baked into the params

    tb, b_pad, num_tiles = _batch_tiling(B, block_batch)
    if b_pad != B:
        state = jnp.pad(state, ((0, b_pad - B), (0, 0)))

    out = pl.pallas_call(
        _actor_kernel(max_action, action_dim, act_dtype),
        out_shape=jax.ShapeDtypeStruct((b_pad, action_dim), jnp.float32),
        grid=(num_tiles,),
        in_specs=[
            pl.BlockSpec((tb, S), lambda i: (i, 0)),       # state tile, per step
            pl.BlockSpec(w1.shape, lambda i: (0, 0)),      # weights/biases: VMEM-resident
            pl.BlockSpec(b1.shape, lambda i: (0, 0)),
            pl.BlockSpec(w2.shape, lambda i: (0, 0)),
            pl.BlockSpec(b2.shape, lambda i: (0, 0)),
            pl.BlockSpec(w3.shape, lambda i: (0, 0)),
            pl.BlockSpec(b3.shape, lambda i: (0, 0)),
        ],
        out_specs=pl.BlockSpec((tb, action_dim), lambda i: (i, 0)),
        compiler_params=pltpu.CompilerParams(
            dimension_semantics=("parallel",),             # 2-TC sharding on v7x
        ),
    )(state, w1, b1, w2, b2, w3, b3)

    if b_pad != B:
        out = out[:B]
    return out


def actor_ref_f32(state, params, max_action):
    """Pure-JAX f32 reference (matches the PyTorch module)."""
    w1, b1, w2, b2, w3, b3 = params
    x = jnp.maximum(state @ w1 + b1, 0.0)
    x = jnp.maximum(x @ w2 + b2, 0.0)
    return jnp.tanh(x @ w3 + b3) * max_action


def actor_ref_kernel_math(state, kernel_params, action_dim, max_action):
    """Pure-JAX reference mirroring the kernel's exact dtype sequence."""
    w1, b1, w2, b2, w3, b3 = kernel_params
    act_dtype = b1.dtype
    x = state.astype(jnp.bfloat16)
    h1 = jnp.dot(x, w1, preferred_element_type=jnp.float32)
    h1 = jnp.maximum(h1.astype(act_dtype) + b1, 0.0)
    h2 = jnp.dot(h1.astype(jnp.bfloat16), w2, preferred_element_type=jnp.float32)
    h2 = jnp.maximum(h2.astype(act_dtype) + b2, 0.0)
    y = jnp.dot(h2.astype(jnp.bfloat16), w3, preferred_element_type=jnp.float32)
    y = jnp.tanh(y + b3) * max_action
    return y[:, :action_dim].astype(jnp.float32)


if __name__ == "__main__":
    key = jax.random.PRNGKey(0)
    k_params, k_state1, k_state2 = jax.random.split(key, 3)

    state_dim = 16
    action_dim = 4
    max_action = 2.0

    act_dtype = default_epilogue_dtype()
    raw_params = init_actor_params(k_params, state_dim, action_dim)
    kernel_params, adim = prepare_actor_params(raw_params, act_dtype=act_dtype)

    # Case 1: small batch (single 8-row tile).
    state_small = jax.random.normal(k_state1, (8, state_dim), jnp.float32)
    # Case 2: larger, awkward batch (exercises grid + minimal row padding).
    state_big = jax.random.normal(k_state2, (300, state_dim), jnp.float32)

    for state in (state_small, state_big):
        out = actor_forward(state, kernel_params, adim, max_action)
        out = jax.block_until_ready(out)
        assert out.shape == (state.shape[0], action_dim)

        # Tight check against a reference using identical dtypes/math.
        ref_k = actor_ref_kernel_math(state, kernel_params, adim, max_action)
        assert jnp.allclose(out, ref_k, atol=2e-3, rtol=2e-3), \
            "mismatch vs kernel-math reference"

        # Loose check against the exact f32 PyTorch-equivalent math
        # (bf16 weights/epilogue introduce ~1e-2-level deviation, as expected).
        ref_f32 = actor_ref_f32(state, raw_params, max_action)
        assert jnp.allclose(out, ref_f32, atol=5e-2, rtol=5e-2), \
            "mismatch vs f32 reference"

    print("KERNEL_OK")
</pallas_src>

<mosaic_0001>
module attributes {stable_mosaic.version = 11 : i64} {
  func.func @kernel(%arg0: i32, %arg1: memref<8x16xf32, #tpu.memory_space<vmem>>, %arg2: memref<16x512xbf16, #tpu.memory_space<vmem>>, %arg3: memref<1x512xf32, #tpu.memory_space<vmem>>, %arg4: memref<512x384xbf16, #tpu.memory_space<vmem>>, %arg5: memref<1x384xf32, #tpu.memory_space<vmem>>, %arg6: memref<384x128xbf16, #tpu.memory_space<vmem>>, %arg7: memref<1x128xf32, #tpu.memory_space<vmem>>, %arg8: memref<8x4xf32, #tpu.memory_space<vmem>>) attributes {dimension_semantics = [#tpu.dimension_semantics<parallel>], iteration_bounds = array<i64: 1>, scalar_prefetch = 0 : i64, scratch_operands = 0 : i64, tpu.core_type = #tpu.core_type<tc>, window_params = [{transform_indices = @transform_0, window_bounds = array<i64: 8, 16>}, {pipeline_mode = #tpu.pipeline_mode<synchronous>, transform_indices = @transform_1, window_bounds = array<i64: 16, 512>}, {pipeline_mode = #tpu.pipeline_mode<synchronous>, transform_indices = @transform_2, window_bounds = array<i64: 1, 512>}, {pipeline_mode = #tpu.pipeline_mode<synchronous>, transform_indices = @transform_3, window_bounds = array<i64: 512, 384>}, {pipeline_mode = #tpu.pipeline_mode<synchronous>, transform_indices = @transform_4, window_bounds = array<i64: 1, 384>}, {pipeline_mode = #tpu.pipeline_mode<synchronous>, transform_indices = @transform_5, window_bounds = array<i64: 384, 128>}, {pipeline_mode = #tpu.pipeline_mode<synchronous>, transform_indices = @transform_6, window_bounds = array<i64: 1, 128>}, {transform_indices = @transform_7, window_bounds = array<i64: 8, 4>}]} {
    %c0 = arith.constant 0 : index
    %c0_0 = arith.constant 0 : index
    %0 = vector.load %arg1[%c0, %c0_0] : memref<8x16xf32, #tpu.memory_space<vmem>>, vector<8x16xf32>
    %1 = arith.truncf %0 : vector<8x16xf32> to vector<8x16xbf16>
    %c0_1 = arith.constant 0 : index
    %c0_2 = arith.constant 0 : index
    %2 = vector.load %arg2[%c0_1, %c0_2] : memref<16x512xbf16, #tpu.memory_space<vmem>>, vector<16x512xbf16>
    %cst = arith.constant dense<0.000000e+00> : vector<8x512xf32>
    %3 = tpu.matmul %1, %2, %cst {dimension_numbers = #tpu.dot_dimension_numbers<[1], [0], [0], [1], [0, 0, 1, 1], [], []>} : vector<8x16xbf16>, vector<16x512xbf16>, vector<8x512xf32> -> vector<8x512xf32>
    %c0_3 = arith.constant 0 : index
    %c0_4 = arith.constant 0 : index
    %4 = vector.load %arg3[%c0_3, %c0_4] : memref<1x512xf32, #tpu.memory_space<vmem>>, vector<1x512xf32>
    %5 = vector.broadcast %4 : vector<1x512xf32> to vector<8x512xf32>
    %6 = arith.addf %3, %5 : vector<8x512xf32>
    %cst_5 = arith.constant 0.000000e+00 : f32
    %7 = vector.broadcast %cst_5 : f32 to vector<8x512xf32>
    %8 = arith.maximumf %6, %7 : vector<8x512xf32>
    %9 = arith.truncf %8 : vector<8x512xf32> to vector<8x512xbf16>
    %c0_6 = arith.constant 0 : index
    %c0_7 = arith.constant 0 : index
    %10 = vector.load %arg4[%c0_6, %c0_7] : memref<512x384xbf16, #tpu.memory_space<vmem>>, vector<512x384xbf16>
    %cst_8 = arith.constant dense<0.000000e+00> : vector<8x384xf32>
    %11 = tpu.matmul %9, %10, %cst_8 {dimension_numbers = #tpu.dot_dimension_numbers<[1], [0], [0], [1], [0, 0, 1, 1], [], []>} : vector<8x512xbf16>, vector<512x384xbf16>, vector<8x384xf32> -> vector<8x384xf32>
    %c0_9 = arith.constant 0 : index
    %c0_10 = arith.constant 0 : index
    %12 = vector.load %arg5[%c0_9, %c0_10] : memref<1x384xf32, #tpu.memory_space<vmem>>, vector<1x384xf32>
    %13 = vector.broadcast %12 : vector<1x384xf32> to vector<8x384xf32>
    %14 = arith.addf %11, %13 : vector<8x384xf32>
    %cst_11 = arith.constant 0.000000e+00 : f32
    %15 = vector.broadcast %cst_11 : f32 to vector<8x384xf32>
    %16 = arith.maximumf %14, %15 : vector<8x384xf32>
    %17 = arith.truncf %16 : vector<8x384xf32> to vector<8x384xbf16>
    %c0_12 = arith.constant 0 : index
    %c0_13 = arith.constant 0 : index
    %18 = vector.load %arg6[%c0_12, %c0_13] : memref<384x128xbf16, #tpu.memory_space<vmem>>, vector<384x128xbf16>
    %cst_14 = arith.constant dense<0.000000e+00> : vector<8x128xf32>
    %19 = tpu.matmul %17, %18, %cst_14 {dimension_numbers = #tpu.dot_dimension_numbers<[1], [0], [0], [1], [0, 0, 1, 1], [], []>} : vector<8x384xbf16>, vector<384x128xbf16>, vector<8x128xf32> -> vector<8x128xf32>
    %c0_15 = arith.constant 0 : index
    %c0_16 = arith.constant 0 : index
    %20 = vector.load %arg7[%c0_15, %c0_16] : memref<1x128xf32, #tpu.memory_space<vmem>>, vector<1x128xf32>
    %21 = vector.broadcast %20 : vector<1x128xf32> to vector<8x128xf32>
    %22 = arith.addf %19, %21 : vector<8x128xf32>
    %23 = math.tanh %22 : vector<8x128xf32>
    %cst_17 = arith.constant 2.000000e+00 : f32
    %24 = vector.broadcast %cst_17 : f32 to vector<8x128xf32>
    %25 = arith.mulf %23, %24 : vector<8x128xf32>
    %26 = vector.extract_strided_slice %25 {offsets = [0, 0], sizes = [8, 4], strides = [1, 1]} : vector<8x128xf32> to vector<8x4xf32>
    %c0_18 = arith.constant 0 : index
    %c0_19 = arith.constant 0 : index
    %27 = vector.load %arg8[%c0_18, %c0_19] : memref<8x4xf32, #tpu.memory_space<vmem>>, vector<8x4xf32>
    tpu.vector_store %arg8[%c0_18, %c0_19], %26 {strides = array<i32>} : memref<8x4xf32, #tpu.memory_space<vmem>>, vector<8x4xf32>,
    return
  }
  func.func @transform_0(%arg0: i32) -> (i32, i32) {
    %c0_i32 = arith.constant 0 : i32
    %c0_i32_0 = arith.constant 0 : i32
    return %arg0, %c0_i32 : i32, i32
  }
  func.func @transform_1(%arg0: i32) -> (i32, i32) {
    %c0_i32 = arith.constant 0 : i32
    %c0_i32_0 = arith.constant 0 : i32
    %c0_i32_1 = arith.constant 0 : i32
    return %c0_i32, %c0_i32_0 : i32, i32
  }
  func.func @transform_2(%arg0: i32) -> (i32, i32) {
    %c0_i32 = arith.constant 0 : i32
    %c0_i32_0 = arith.constant 0 : i32
    %c0_i32_1 = arith.constant 0 : i32
    return %c0_i32, %c0_i32_0 : i32, i32
  }
  func.func @transform_3(%arg0: i32) -> (i32, i32) {
    %c0_i32 = arith.constant 0 : i32
    %c0_i32_0 = arith.constant 0 : i32
    %c0_i32_1 = arith.constant 0 : i32
    return %c0_i32, %c0_i32_0 : i32, i32
  }
  func.func @transform_4(%arg0: i32) -> (i32, i32) {
    %c0_i32 = arith.constant 0 : i32
    %c0_i32_0 = arith.constant 0 : i32
    %c0_i32_1 = arith.constant 0 : i32
    return %c0_i32, %c0_i32_0 : i32, i32
  }
  func.func @transform_5(%arg0: i32) -> (i32, i32) {
    %c0_i32 = arith.constant 0 : i32
    %c0_i32_0 = arith.constant 0 : i32
    %c0_i32_1 = arith.constant 0 : i32
    return %c0_i32, %c0_i32_0 : i32, i32
  }
  func.func @transform_6(%arg0: i32) -> (i32, i32) {
    %c0_i32 = arith.constant 0 : i32
    %c0_i32_0 = arith.constant 0 : i32
    %c0_i32_1 = arith.constant 0 : i32
    return %c0_i32, %c0_i32_0 : i32, i32
  }
  func.func @transform_7(%arg0: i32) -> (i32, i32) {
    %c0_i32 = arith.constant 0 : i32
    %c0_i32_0 = arith.constant 0 : i32
    return %arg0, %c0_i32 : i32, i32
  }
}

</mosaic_0001>

<bundles_post_ra>
// kernel: actor_forward.1
= control target key start
LH: loop header
LB: loop body
LE: loop exit
PB: predicated region body
PF: predicated region fallthrough
CT: control target
= control target key end

     0   :  { %12 = vsyncpa [#allocation3], 0  ;;  %s2132_s0 = inlined_call_operand.hbm [shape: f32[8,16], index: 0, kind: input, shape index: {}]   ;;  %s2133_s1 = inlined_call_operand.hbm [shape: bf16[16,512], index: 1, kind: input, shape index: {}]   ;;  %s2134_s2 = inlined_call_operand.hbm [shape: f32[1,512], index: 2, kind: input, shape index: {}]   ;;  %s2135_s3 = inlined_call_operand.hbm [shape: bf16[512,384], index: 3, kind: input, shape index: {}]   ;;  %s2136_s4 = inlined_call_operand.vmem [shape: f32[1,384], index: 4, kind: input, shape index: {}]   ;;  %s2137_s5 = inlined_call_operand.hbm [shape: bf16[384,128], index: 5, kind: input, shape index: {}]   ;;  %s2138_s6 = inlined_call_operand.vmem [shape: f32[1,128], index: 6, kind: input, shape index: {}]   ;;  %s2139_s7 = inlined_call_operand.vmem [shape: f32[8,4], index: 7, kind: output, shape index: {}]  }
   0x1   :  { %13 = vsyncpa [#allocation5], 0  ;;  %s30_s26 = sshll.u32 %s2133_s1, 4  ;;  %s31_s26 = int_to_ptr.hbm [resolvable:$true] %s30_s26 }
   0x2   :  { %14 = vsyncpa [#allocation8], 0  ;;  %s2021_s27 = smov [#allocation4]   ;;  %s54_s8 = sshll.u32 %s2135_s3, 4  ;;  %s55_s8 = int_to_ptr.hbm [resolvable:$true] %s54_s8 }
   0x3   :  { %s32_s28 = sshll.u32 %s2021_s27, 4  ;;  %s2022_s9 = smov 256   ;;  %s33_s28 = int_to_ptr.vmem [resolvable:$true] %s32_s28 }
   0x4   :  { %s2023_s10 = smov 16   ;;  %s2024_s11 = smov [#allocation7]  }
   0x5   :  { %38 = dma.hbm_to_vmem [thread:$0]  %s31_s26, 512, %s33_s28, [#allocation5], %s2022_s9, %s2022_s9, %s2023_s10  }
   0x6   :  { %s56_s12 = sshll.u32 %s2024_s11, 4  ;;  %s2025_s13 = smov 192   ;;  %s57_s12 = int_to_ptr.vmem [resolvable:$true] %s56_s12 }
   0x7   :  { %s2026_s14 = smov 12   ;;  %s20_s16 = sshll.u32 %s2132_s0, 4  ;;  %s21_s16 = int_to_ptr.hbm [resolvable:$true] %s20_s16 }
   0x8   :  { %62 = dma.hbm_to_vmem [thread:$0]  %s55_s8, 12288, %s57_s12, [#allocation8], %s2025_s13, %s2025_s13, %s2026_s14  }
   0x9   :  { %s2027_s17 = smov [#allocation2]   ;;  %s44_s20 = sshll.u32 %s2134_s2, 4  ;;  %s45_s20 = int_to_ptr.hbm [resolvable:$true] %s44_s20 }
   0xa   :  { %s22_s18 = sshll.u32 %s2027_s17, 4  ;;  %s2028_s21 = smov [#allocation6]   ;;  %s23_s18 = int_to_ptr.vmem [resolvable:$true] %s22_s18 }
   0xb   :  { %25 = dma.hbm_to_vmem [thread:$0]  %s21_s16, 128, %s23_s18, [#allocation3]  }
   0xc   :  { %s46_s22 = sshll.u32 %s2028_s21, 4  ;;  %s69_s25 = sshll.u32 %s2137_s5, 4  ;;  %s47_s22 = int_to_ptr.vmem [resolvable:$true] %s46_s22  ;;  %s70_s25 = int_to_ptr.hbm [resolvable:$true] %s69_s25 }
   0xd   :  { %49 = dma.hbm_to_vmem [thread:$0]  %s45_s20, 64, %s47_s22, [#allocation5]  }
   0xe   :  { %s2029_s0 = smov [#allocation9]   ;;  %s2030_s27 = smov 64  }
   0xf   :  { %s71_s26 = sshll.u32 %s2029_s0, 4  ;;  %s2031_s28 = smov 4   ;;  %s72_s26 = int_to_ptr.vmem [resolvable:$true] %s71_s26 }
  0x10   :  { %77 = dma.hbm_to_vmem [thread:$0]  %s70_s25, 3072, %s72_s26, [#allocation8], %s2030_s27, %s2030_s27, %s2031_s28  }
  0x11   :  { %2015 = dma.done.wait [#allocation3], 128  }
  0x12   :  { %2016 = vsyncadd [#allocation3], 4294967168 }
  0x13   :  { %2017 = dma.done.wait [#allocation5], 576  }
  0x14   :  { %2018 = vsyncadd [#allocation5], 4294966720 }
  0x15   :  { %2019 = dma.done.wait [#allocation8], 15360  }
  0x16   :  { %2020 = vsyncadd [#allocation8], 4294951936  ;;  %v1259_v0 = vld [vmem:[#allocation4] sm:$0xf]  ;;  %v1759_v1 = vld [vmem:[#allocation4 + $0xc] sm:$0xf0] }
  0x17   :  { %v1757_v2 = vld [vmem:[#allocation4 + $0x4] sm:$0xf]  ;;  %v1260_v3 = vor.u32 %v1759_v1, %v1259_v0  ;;  %v1261_v4 = vld [vmem:[#allocation4 + $0x10] sm:$0xf0]  ;;  %v1267_v5 = vld [vmem:[#allocation4 + $0x8] sm:$0xf] }
  0x18   :  { %v1760_v6 = vld [vmem:[#allocation4 + $0x14] sm:$0xf0]  ;;  %v1264_v7 = vor.u32 %v1757_v2, %v1261_v4  ;;  %vm137_vm0 = vcmask 130048   ;;  %v1758_v10 = vld [vmem:[#allocation4 + $0xc] sm:$0xf]  ;;  %vm1248_vm1 = vcmask 31744  }
  0x19   :  { %v1268_v8 = vor.u32 %v1760_v6, %v1267_v5  ;;  %v101_v9 = vld [vmem:[#allocation2] sm:$0xff]  ;;  %148 = vmatpush.bf16.msra.mxu3 %v1260_v3  ;;  %v1459_v14 = vld [vmem:[#allocation7 + $0x168] sm:$0xf]  ;;  %v1447_v16 = vld [vmem:[#allocation7 + $0x150] sm:$0xf] }
  0x1a   :  { %v1269_v11 = vld [vmem:[#allocation4 + $0x18] sm:$0xf0]  ;;  %v2087_v12 = vpack.c.bf16 %v101_v9, %v101_v9  ;;  %v1807_v15 = vld [vmem:[#allocation7 + $0x170] sm:$0xf0]  ;;  %161 = vmatpush.bf16.msra.mxu1 %v1264_v7  ;;  %v1804_v18 = vld [vmem:[#allocation7 + $0x158] sm:$0xf0] }
  0x1b   :  { %v1272_v13 = vor.u32 %v1758_v10, %v1269_v11  ;;  %174 = vmatpush.bf16.msra.mxu2 %v1268_v8  ;;  %v1460_v17 = vor.u32 %v1807_v15, %v1459_v14  ;;  %v1363_v19 = vld [vmem:[#allocation7 + $0xa8] sm:$0xf]  ;;  %v1783_v20 = vld [vmem:[#allocation7 + $0xb0] sm:$0xf0]  ;;  %v1448_v24 = vor.u32 %v1804_v18, %v1447_v16  ;;  %v1435_v26 = vld [vmem:[#allocation7 + $0x138] sm:$0xf] }
  0x1c   :  { %v1364_v21 = vor.u32 %v1783_v20, %v1363_v19  ;;  %v1555_v22 = vld [vmem:[#allocation7 + $0x228] sm:$0xf]  ;;  %v1831_v23 = vld [vmem:[#allocation7 + $0x230] sm:$0xf0]  ;;  %1273 = vmatmul.msk.bf16.vlgmr.msra.gmra.mxu3 %vm137_vm0, %v2087_v12  ;;  %v1351_v27 = vld [vmem:[#allocation7 + $0x90] sm:$0xf] }
  0x1d   :  { %187 = vmatpush.bf16.msrb.mxu3 %v1272_v13  ;;  %v1556_v25 = vor.u32 %v1831_v23, %v1555_v22  ;;  %v1780_v28 = vld [vmem:[#allocation7 + $0x98] sm:$0xf0]  ;;  %1274 = vmatmul.msk.bf16.vlgmr.msra.gmra.mxu1 %vm137_vm0, %v2087_v12  ;;  %v1801_v29 = vld [vmem:[#allocation7 + $0x140] sm:$0xf0]  ;;  %v1543_v30 = vld [vmem:[#allocation7 + $0x210] sm:$0xf] }
  0x1e   :  { %862 = vmatpush.bf16.msrb.mxu1 %v1460_v17  ;;  %1275 = vmatmul.msk.bf16.vlgmr.msra.gmra.mxu2 %vm137_vm0, %v2087_v12  ;;  %v1828_v31 = vld [vmem:[#allocation7 + $0x218] sm:$0xf0]  ;;  %v1352_v32 = vor.u32 %v1780_v28, %v1351_v27  ;;  %v1339_v34 = vld [vmem:[#allocation7 + $0x78] sm:$0xf]  ;;  %v1777_v35 = vld [vmem:[#allocation7 + $0x80] sm:$0xf0]  ;;  %v1436_v38 = vor.u32 %v1801_v29, %v1435_v26 }
  0x1f   :  { %849 = vmatpush.bf16.msra.mxu0 %v1364_v21  ;;  %875 = vmatpush.bf16.msrb.mxu2 %v1556_v25  ;;  %v1544_v33 = vor.u32 %v1828_v31, %v1543_v30  ;;  %v1531_v36 = vld [vmem:[#allocation7 + $0x1f8] sm:$0xf]  ;;  %v1825_v37 = vld [vmem:[#allocation7 + $0x200] sm:$0xf0]  ;;  %v1423_v39 = vld [vmem:[#allocation7 + $0x120] sm:$0xf]  ;;  %v1340_v41 = vor.u32 %v1777_v35, %v1339_v34 }
  0x20   :  { %v1798_v40 = vld [vmem:[#allocation7 + $0x128] sm:$0xf0]  ;;  %v1532_v42 = vor.u32 %v1825_v37, %v1531_v36  ;;  %v1327_v43 = vld [vmem:[#allocation7 + $0x60] sm:$0xf]  ;;  %v1651_v47 = vld [vmem:[#allocation7 + $0x2e8] sm:$0xf] }
  0x21   :  { %v1774_v44 = vld [vmem:[#allocation7 + $0x68] sm:$0xf0]  ;;  %v1519_v45 = vld [vmem:[#allocation7 + $0x1e0] sm:$0xf]  ;;  %v1424_v48 = vor.u32 %v1798_v40, %v1423_v39  ;;  %v1855_v49 = vld [vmem:[#allocation7 + $0x2f0] sm:$0xf0] }
  0x22   :  { %863 = vmatpush.bf16.msrb.mxu1 %v1448_v24  ;;  %v1822_v46 = vld [vmem:[#allocation7 + $0x1e8] sm:$0xf0]  ;;  %v1411_v50 = vld [vmem:[#allocation7 + $0x108] sm:$0xf]  ;;  %v1795_v51 = vld [vmem:[#allocation7 + $0x110] sm:$0xf0]  ;;  %v1652_v52 = vor.u32 %v1855_v49, %v1651_v47  ;;  %v1328_v53 = vor.u32 %v1774_v44, %v1327_v43 }
  0x23   :  { %850 = vmatpush.bf16.msra.mxu0 %v1352_v32  ;;  %876 = vmatpush.bf16.msrb.mxu2 %v1544_v33  ;;  %v1520_v54 = vor.u32 %v1822_v46, %v1519_v45  ;;  %v1315_v55 = vld [vmem:[#allocation7 + $0x48] sm:$0xf]  ;;  %v1639_v56 = vld [vmem:[#allocation7 + $0x2d0] sm:$0xf]  ;;  %v1852_v57 = vld [vmem:[#allocation7 + $0x2d8] sm:$0xf0]  ;;  %v1412_v62 = vor.u32 %v1795_v51, %v1411_v50 }
  0x24   :  { %v1771_v58 = vld [vmem:[#allocation7 + $0x50] sm:$0xf0]  ;;  %v1507_v59 = vld [vmem:[#allocation7 + $0x1c8] sm:$0xf]  ;;  %888 = vmatpush.bf16.msra.mxu3 %v1652_v52  ;;  %v1640_v61 = vor.u32 %v1852_v57, %v1639_v56  ;;  %v1399_v63 = vld [vmem:[#allocation7 + $0xf0] sm:$0xf] }
  0x25   :  { %v1819_v60 = vld [vmem:[#allocation7 + $0x1d0] sm:$0xf0]  ;;  %v1792_v0 = vld [vmem:[#allocation7 + $0xf8] sm:$0xf0]  ;;  %v1627_v1 = vld [vmem:[#allocation7 + $0x2b8] sm:$0xf]  ;;  %v1316_v2 = vor.u32 %v1771_v58, %v1315_v55 }
  0x26   :  { %864 = vmatpush.bf16.msrb.mxu1 %v1436_v38  ;;  %v1508_v3 = vor.u32 %v1819_v60, %v1507_v59  ;;  %v1303_v4 = vld [vmem:[#allocation7 + $0x30] sm:$0xf]  ;;  %v1849_v5 = vld [vmem:[#allocation7 + $0x2c0] sm:$0xf0]  ;;  %v1768_v6 = vld [vmem:[#allocation7 + $0x38] sm:$0xf0]  ;;  %v1400_v10 = vor.u32 %v1792_v0, %v1399_v63 }
  0x27   :  { %851 = vmatpush.bf16.msra.mxu0 %v1340_v41  ;;  %877 = vmatpush.bf16.msrb.mxu2 %v1532_v42  ;;  %v1495_v7 = vld [vmem:[#allocation7 + $0x1b0] sm:$0xf]  ;;  %v1816_v8 = vld [vmem:[#allocation7 + $0x1b8] sm:$0xf0]  ;;  %v1628_v9 = vor.u32 %v1849_v5, %v1627_v1  ;;  %v1615_v11 = vld [vmem:[#allocation7 + $0x2a0] sm:$0xf]  ;;  %v1304_v16 = vor.u32 %v1768_v6, %v1303_v4 }
  0x28   :  { %889 = vmatpush.bf16.msra.mxu3 %v1640_v61  ;;  %v1846_v13 = vld [vmem:[#allocation7 + $0x2a8] sm:$0xf0]  ;;  %v1387_v14 = vld [vmem:[#allocation7 + $0xd8] sm:$0xf]  ;;  %v1789_v15 = vld [vmem:[#allocation7 + $0xe0] sm:$0xf0]  ;;  %v1496_v17 = vor.u32 %v1816_v8, %v1495_v7 }
  0x29   :  { %v1291_v18 = vld [vmem:[#allocation7 + $0x18] sm:$0xf]  ;;  %v1765_v19 = vld [vmem:[#allocation7 + $0x20] sm:$0xf0]  ;;  %v1616_v22 = vor.u32 %v1846_v13, %v1615_v11  ;;  %v1388_v23 = vor.u32 %v1789_v15, %v1387_v14  ;;  %v1603_v24 = vld [vmem:[#allocation7 + $0x288] sm:$0xf] }
  0x2a   :  { %865 = vmatpush.bf16.msrb.mxu1 %v1424_v48  ;;  %v1483_v20 = vld [vmem:[#allocation7 + $0x198] sm:$0xf]  ;;  %v1813_v21 = vld [vmem:[#allocation7 + $0x1a0] sm:$0xf0]  ;;  %v1375_v25 = vld [vmem:[#allocation7 + $0xc0] sm:$0xf]  ;;  %v1292_v29 = vor.u32 %v1765_v19, %v1291_v18 }
  0x2b   :  { %852 = vmatpush.bf16.msra.mxu0 %v1328_v53  ;;  %878 = vmatpush.bf16.msrb.mxu2 %v1520_v54  ;;  %v1786_v26 = vld [vmem:[#allocation7 + $0xc8] sm:$0xf0]  ;;  %v1461_v28 = vld [vmem:[#allocation7 + $0x174] sm:$0xf0]  ;;  %v1484_v30 = vor.u32 %v1813_v21, %v1483_v20  ;;  %v1279_v31 = vld [vmem:[#allocation7] sm:$0xf] }
  0x2c   :  { %1276 = vmatmul.msk.bf16.vlgmr.msrb.gmra.mxu3 %vm137_vm0, %v2087_v12  ;;  %v1843_v12 = vld [vmem:[#allocation7 + $0x290] sm:$0xf0]  ;;  %v1806_v27 = vld [vmem:[#allocation7 + $0x16c] sm:$0xf]  ;;  %v1471_v33 = vld [vmem:[#allocation7 + $0x180] sm:$0xf]  ;;  %v1376_v37 = vor.u32 %v1786_v26, %v1375_v25 }
  0x2d   :  { %890 = vmatpush.bf16.msra.mxu3 %v1628_v9  ;;  %v1762_v32 = vld [vmem:[#allocation7 + $0x8] sm:$0xf0]  ;;  %v1604_v36 = vor.u32 %v1843_v12, %v1603_v24  ;;  %v1365_v38 = vld [vmem:[#allocation7 + $0xb4] sm:$0xf0]  ;;  %v1464_v41 = vor.u32 %v1806_v27, %v1461_v28  ;;  %v1591_v42 = vld [vmem:[#allocation7 + $0x270] sm:$0xf] }
  0x2e   :  { %866 = vmatpush.bf16.msrb.mxu1 %v1412_v62  ;;  %v1810_v34 = vld [vmem:[#allocation7 + $0x188] sm:$0xf0]  ;;  %v1557_v40 = vld [vmem:[#allocation7 + $0x234] sm:$0xf0]  ;;  %v1840_v43 = vld [vmem:[#allocation7 + $0x278] sm:$0xf0]  ;;  %v1280_v46 = vor.u32 %v1762_v32, %v1279_v31 }
  0x2f   :  { %853 = vmatpush.bf16.msra.mxu0 %v1316_v2  ;;  %879 = vmatpush.bf16.msrb.mxu2 %v1508_v3  ;;  %v1782_v35 = vld [vmem:[#allocation7 + $0xac] sm:$0xf]  ;;  %v1803_v44 = vld [vmem:[#allocation7 + $0x154] sm:$0xf]  ;;  %v1449_v45 = vld [vmem:[#allocation7 + $0x15c] sm:$0xf0]  ;;  %v1472_v47 = vor.u32 %v1810_v34, %v1471_v33  ;;  %v1592_v54 = vor.u32 %v1840_v43, %v1591_v42 }
  0x30   :  { %v1830_v39 = vld [vmem:[#allocation7 + $0x22c] sm:$0xf]  ;;  %v1368_v48 = vor.u32 %v1782_v35, %v1365_v38  ;;  %v1779_v50 = vld [vmem:[#allocation7 + $0x94] sm:$0xf]  ;;  %v1353_v51 = vld [vmem:[#allocation7 + $0x9c] sm:$0xf0]  ;;  %v1452_v55 = vor.u32 %v1803_v44, %v1449_v45 }
  0x31   :  { %891 = vmatpush.bf16.msra.mxu3 %v1616_v22  ;;  %v1560_v49 = vor.u32 %v1830_v39, %v1557_v40  ;;  %v1827_v52 = vld [vmem:[#allocation7 + $0x214] sm:$0xf]  ;;  %v1545_v53 = vld [vmem:[#allocation7 + $0x21c] sm:$0xf0]  ;;  %v1579_v56 = vld [vmem:[#allocation7 + $0x258] sm:$0xf]  ;;  %v1356_v60 = vor.u32 %v1779_v50, %v1353_v51 }
  0x32   :  { %867 = vmatpush.bf16.msrb.mxu1 %v1400_v10  ;;  %v1837_v57 = vld [vmem:[#allocation7 + $0x260] sm:$0xf0]  ;;  %v1800_v58 = vld [vmem:[#allocation7 + $0x13c] sm:$0xf]  ;;  %v1437_v59 = vld [vmem:[#allocation7 + $0x144] sm:$0xf0]  ;;  %v1548_v61 = vor.u32 %v1827_v52, %v1545_v53 }
  0x33   :  { %854 = vmatpush.bf16.msra.mxu0 %v1304_v16  ;;  %880 = vmatpush.bf16.msrb.mxu2 %v1496_v17  ;;  %v1776_v62 = vld [vmem:[#allocation7 + $0x7c] sm:$0xf]  ;;  %v1341_v63 = vld [vmem:[#allocation7 + $0x84] sm:$0xf0]  ;;  %v1580_v2 = vor.u32 %v1837_v57, %v1579_v56  ;;  %v1440_v3 = vor.u32 %v1800_v58, %v1437_v59  ;;  %v1797_v4 = vld [vmem:[#allocation7 + $0x124] sm:$0xf] }
  0x34   :  { %v1824_v0 = vld [vmem:[#allocation7 + $0x1fc] sm:$0xf]  ;;  %v1533_v1 = vld [vmem:[#allocation7 + $0x204] sm:$0xf0]  ;;  %v1425_v5 = vld [vmem:[#allocation7 + $0x12c] sm:$0xf0]  ;;  %v1344_v6 = vor.u32 %v1776_v62, %v1341_v63 }
  0x35   :  { %892 = vmatpush.bf16.msra.mxu3 %v1604_v36  ;;  %v1536_v7 = vor.u32 %v1824_v0, %v1533_v1  ;;  %v1773_v8 = vld [vmem:[#allocation7 + $0x64] sm:$0xf]  ;;  %v1329_v9 = vld [vmem:[#allocation7 + $0x6c] sm:$0xf0]  ;;  %v1428_v13 = vor.u32 %v1797_v4, %v1425_v5  ;;  %v1794_v14 = vld [vmem:[#allocation7 + $0x10c] sm:$0xf] }
  0x36   :  { %868 = vmatpush.bf16.msrb.mxu1 %v1388_v23  ;;  %v1821_v10 = vld [vmem:[#allocation7 + $0x1e4] sm:$0xf]  ;;  %v1521_v11 = vld [vmem:[#allocation7 + $0x1ec] sm:$0xf0]  ;;  %v1413_v15 = vld [vmem:[#allocation7 + $0x114] sm:$0xf0]  ;;  %v1332_v16 = vor.u32 %v1773_v8, %v1329_v9 }
  0x37   :  { %855 = vmatpush.bf16.msra.mxu0 %v1292_v29  ;;  %881 = vmatpush.bf16.msrb.mxu2 %v1484_v30  ;;  %v1524_v17 = vor.u32 %v1821_v10, %v1521_v11  ;;  %v1416_v18 = vor.u32 %v1794_v14, %v1413_v15  ;;  %v1791_v19 = vld [vmem:[#allocation7 + $0xf4] sm:$0xf]  ;;  %v1401_v20 = vld [vmem:[#allocation7 + $0xfc] sm:$0xf0]  ;;  %v1834_v23 = vld [vmem:[#allocation7 + $0x248] sm:$0xf0] }
  0x38   :  { %v1404_v21 = vor.u32 %v1791_v19, %v1401_v20  ;;  %v1567_v22 = vld [vmem:[#allocation7 + $0x240] sm:$0xf]  ;;  %v1770_v12 = vld [vmem:[#allocation7 + $0x4c] sm:$0xf]  ;;  %v1317_v25 = vld [vmem:[#allocation7 + $0x54] sm:$0xf0] }
  0x39   :  { %893 = vmatpush.bf16.msra.mxu3 %v1592_v54  ;;  %v1568_v24 = vor.u32 %v1834_v23, %v1567_v22  ;;  %v1818_v26 = vld [vmem:[#allocation7 + $0x1cc] sm:$0xf]  ;;  %v1320_v27 = vor.u32 %v1770_v12, %v1317_v25  ;;  %v1509_v28 = vld [vmem:[#allocation7 + $0x1d4] sm:$0xf0]  ;;  %v1788_v33 = vld [vmem:[#allocation7 + $0xdc] sm:$0xf] }
  0x3a   :  { %869 = vmatpush.bf16.msrb.mxu1 %v1376_v37  ;;  %v1854_v29 = vld [vmem:[#allocation7 + $0x2ec] sm:$0xf]  ;;  %v1653_v30 = vld [vmem:[#allocation7 + $0x2f4] sm:$0xf0]  ;;  %v1512_v31 = vor.u32 %v1818_v26, %v1509_v28  ;;  %v1389_v34 = vld [vmem:[#allocation7 + $0xe4] sm:$0xf0] }
  0x3b   :  { %856 = vmatpush.bf16.msra.mxu0 %v1280_v46  ;;  %882 = vmatpush.bf16.msrb.mxu2 %v1472_v47  ;;  %v1656_v32 = vor.u32 %v1854_v29, %v1653_v30  ;;  %v1392_v35 = vor.u32 %v1788_v33, %v1389_v34  ;;  %v1767_v36 = vld [vmem:[#allocation7 + $0x34] sm:$0xf]  ;;  %v1305_v37 = vld [vmem:[#allocation7 + $0x3c] sm:$0xf0]  ;;  %v1785_v45 = vld [vmem:[#allocation7 + $0xc4] sm:$0xf] }
  0x3c   :  { %v1815_v38 = vld [vmem:[#allocation7 + $0x1b4] sm:$0xf]  ;;  %v1308_v39 = vor.u32 %v1767_v36, %v1305_v37  ;;  %v1497_v40 = vld [vmem:[#allocation7 + $0x1bc] sm:$0xf0]  ;;  %v1377_v46 = vld [vmem:[#allocation7 + $0xcc] sm:$0xf0] }
  0x3d   :  { %894 = vmatpush.bf16.msra.mxu3 %v1580_v2  ;;  %v1641_v42 = vld [vmem:[#allocation7 + $0x2dc] sm:$0xf0]  ;;  %v1500_v43 = vor.u32 %v1815_v38, %v1497_v40  ;;  %v1380_v47 = vor.u32 %v1785_v45, %v1377_v46  ;;  %v1812_v50 = vld [vmem:[#allocation7 + $0x19c] sm:$0xf]  ;;  %v1485_v52 = vld [vmem:[#allocation7 + $0x1a4] sm:$0xf0] }
  0x3e   :  { %914 = vmatpush.bf16.msra.mxu1 %v1464_v41  ;;  %v1851_v41 = vld [vmem:[#allocation7 + $0x2d4] sm:$0xf]  ;;  %v1848_v53 = vld [vmem:[#allocation7 + $0x2bc] sm:$0xf]  ;;  %v1629_v54 = vld [vmem:[#allocation7 + $0x2c4] sm:$0xf0] }
  0x3f   :  { %901 = vmatpush.bf16.msrb.mxu0 %v1368_v48  ;;  %927 = vmatpush.bf16.msra.mxu2 %v1560_v49  ;;  %v1644_v44 = vor.u32 %v1851_v41, %v1641_v42  ;;  %v1764_v48 = vld [vmem:[#allocation7 + $0x1c] sm:$0xf]  ;;  %v1293_v49 = vld [vmem:[#allocation7 + $0x24] sm:$0xf0]  ;;  %v1632_v56 = vor.u32 %v1848_v53, %v1629_v54  ;;  %v1761_v57 = vld [vmem:[#allocation7 + $0x4] sm:$0xf] }
  0x40   :  { %v1296_v51 = vor.u32 %v1764_v48, %v1293_v49  ;;  %v1281_v58 = vld [vmem:[#allocation7 + $0xc] sm:$0xf0]  ;;  %v1809_v59 = vld [vmem:[#allocation7 + $0x184] sm:$0xf]  ;;  %v1842_v2 = vld [vmem:[#allocation7 + $0x28c] sm:$0xf] }
  0x41   :  { %895 = vmatpush.bf16.msra.mxu3 %v1568_v24  ;;  %v1845_v62 = vld [vmem:[#allocation7 + $0x2a4] sm:$0xf]  ;;  %v1617_v63 = vld [vmem:[#allocation7 + $0x2ac] sm:$0xf0]  ;;  %v1839_v5 = vld [vmem:[#allocation7 + $0x274] sm:$0xf] }
  0x42   :  { %915 = vmatpush.bf16.msra.mxu1 %v1452_v55  ;;  %v1488_v55 = vor.u32 %v1812_v50, %v1485_v52  ;;  %v1620_v1 = vor.u32 %v1845_v62, %v1617_v63  ;;  %v1836_v8 = vld [vmem:[#allocation7 + $0x25c] sm:$0xf]  ;;  %v1581_v9 = vld [vmem:[#allocation7 + $0x264] sm:$0xf0]  ;;  %v1569_v14 = vld [vmem:[#allocation7 + $0x24c] sm:$0xf0] }
  0x43   :  { %902 = vmatpush.bf16.msrb.mxu0 %v1356_v60  ;;  %928 = vmatpush.bf16.msra.mxu2 %v1548_v61  ;;  %v1284_v60 = vor.u32 %v1761_v57, %v1281_v58  ;;  %v1473_v61 = vld [vmem:[#allocation7 + $0x18c] sm:$0xf0]  ;;  %v1584_v10 = vor.u32 %v1836_v8, %v1581_v9  ;;  %v2097_v11 = vld [vmem:[#allocation6] sm:$0xf]  ;;  %v1455_v26 = vld [vmem:[#allocation7 + $0x158] sm:$0xf] }
  0x44   :  { %v1476_v0 = vor.u32 %v1809_v59, %v1473_v61  ;;  %v1467_v19 = vld [vmem:[#allocation7 + $0x170] sm:$0xf]  ;;  %v1808_v20 = vld [vmem:[#allocation7 + $0x178] sm:$0xf0]  ;;  %v111_v23 = vperm.slane %v2097_v11, 2 }
  0x45   :  { %940 = vmatpush.bf16.msrb.mxu3 %v1656_v32  ;;  %v1468_v24 = vor.u32 %v1808_v20, %v1467_v19  ;;  %v1371_v30 = vld [vmem:[#allocation7 + $0xb0] sm:$0xf]  ;;  %v1832_v34 = vld [vmem:[#allocation7 + $0x238] sm:$0xf0]  ;;  %v1443_v40 = vld [vmem:[#allocation7 + $0x140] sm:$0xf] }
  0x46   :  { %916 = vmatpush.bf16.msra.mxu1 %v1440_v3  ;;  %v1605_v3 = vld [vmem:[#allocation7 + $0x294] sm:$0xf0]  ;;  %v1563_v33 = vld [vmem:[#allocation7 + $0x230] sm:$0xf]  ;;  %v1802_v41 = vld [vmem:[#allocation7 + $0x148] sm:$0xf0] }
  0x47   :  { %903 = vmatpush.bf16.msrb.mxu0 %v1344_v6  ;;  %929 = vmatpush.bf16.msra.mxu2 %v1536_v7  ;;  %v1608_v4 = vor.u32 %v1842_v2, %v1605_v3  ;;  %v1593_v6 = vld [vmem:[#allocation7 + $0x27c] sm:$0xf0]  ;;  %v1781_v45 = vld [vmem:[#allocation7 + $0xa0] sm:$0xf0]  ;;  %v1444_v49 = vor.u32 %v1802_v41, %v1443_v40  ;;  %v1431_v52 = vld [vmem:[#allocation7 + $0x128] sm:$0xf] }
  0x48   :  { %v1596_v7 = vor.u32 %v1839_v5, %v1593_v6  ;;  %v1829_v48 = vld [vmem:[#allocation7 + $0x220] sm:$0xf0]  ;;  %v1799_v53 = vld [vmem:[#allocation7 + $0x130] sm:$0xf0]  ;;  %v1778_v57 = vld [vmem:[#allocation7 + $0x88] sm:$0xf0] }
  0x49   :  { %941 = vmatpush.bf16.msrb.mxu3 %v1644_v44  ;;  %v1359_v44 = vld [vmem:[#allocation7 + $0x98] sm:$0xf]  ;;  %v1539_v58 = vld [vmem:[#allocation7 + $0x200] sm:$0xf]  ;;  %v1826_v59 = vld [vmem:[#allocation7 + $0x208] sm:$0xf0] }
  0x4a   :  { %917 = vmatpush.bf16.msra.mxu1 %v1428_v13  ;;  %v1833_v13 = vld [vmem:[#allocation7 + $0x244] sm:$0xf]  ;;  %v1419_v62 = vld [vmem:[#allocation7 + $0x110] sm:$0xf]  ;;  %v1796_v63 = vld [vmem:[#allocation7 + $0x118] sm:$0xf0] }
  0x4b   :  { %904 = vmatpush.bf16.msrb.mxu0 %v1332_v16  ;;  %930 = vmatpush.bf16.msra.mxu2 %v1524_v17  ;;  %v1572_v15 = vor.u32 %v1833_v13, %v1569_v14  ;;  %v110_v16 = vperm.slane %v2097_v11, 1  ;;  %v1335_v2 = vld [vmem:[#allocation7 + $0x68] sm:$0xf]  ;;  %v1775_v3 = vld [vmem:[#allocation7 + $0x70] sm:$0xf0]  ;;  %v1420_v6 = vor.u32 %v1796_v63, %v1419_v62 }
  0x4c   :  { %v1823_v5 = vld [vmem:[#allocation7 + $0x1f0] sm:$0xf0]  ;;  %v1336_v8 = vor.u32 %v1775_v3, %v1335_v2  ;;  %v1407_v9 = vld [vmem:[#allocation7 + $0xf8] sm:$0xf]  ;;  %v1659_v20 = vld [vmem:[#allocation7 + $0x2f0] sm:$0xf] }
  0x4d   :  { %942 = vmatpush.bf16.msrb.mxu3 %v1632_v56  ;;  %v1347_v56 = vld [vmem:[#allocation7 + $0x80] sm:$0xf]  ;;  %v1611_v62 = vld [vmem:[#allocation7 + $0x290] sm:$0xf]  ;;  %v1844_v63 = vld [vmem:[#allocation7 + $0x298] sm:$0xf0] }
  0x4e   :  { %918 = vmatpush.bf16.msra.mxu1 %v1416_v18  ;;  %v1348_v61 = vor.u32 %v1778_v57, %v1347_v56  ;;  %v1299_v40 = vld [vmem:[#allocation7 + $0x20] sm:$0xf]  ;;  %v1811_v56 = vld [vmem:[#allocation7 + $0x190] sm:$0xf0]  ;;  %v1623_v57 = vld [vmem:[#allocation7 + $0x2a8] sm:$0xf] }
  0x4f   :  { %905 = vmatpush.bf16.msrb.mxu0 %v1320_v27  ;;  %931 = vmatpush.bf16.msra.mxu2 %v1512_v31  ;;  %v1805_v27 = vld [vmem:[#allocation7 + $0x160] sm:$0xf0]  ;;  %v1784_v31 = vld [vmem:[#allocation7 + $0xb8] sm:$0xf0] }
  0x50   :  { %v1456_v36 = vor.u32 %v1805_v27, %v1455_v26  ;;  %v1311_v27 = vld [vmem:[#allocation7 + $0x38] sm:$0xf]  ;;  %v1841_v2 = vld [vmem:[#allocation7 + $0x280] sm:$0xf0] }
  0x51   :  { %943 = vmatpush.bf16.msrb.mxu3 %v1620_v1  ;;  %v1540_v1 = vor.u32 %v1826_v59, %v1539_v58  ;;  %v1847_v58 = vld [vmem:[#allocation7 + $0x2b0] sm:$0xf0] }
  0x52   :  { %919 = vmatpush.bf16.msra.mxu1 %v1404_v21  ;;  %v109_v21 = vperm.slane %v2097_v11, 0 }
  0x53   :  { %906 = vmatpush.bf16.msrb.mxu0 %v1308_v39  ;;  %932 = vmatpush.bf16.msra.mxu2 %v1500_v43  ;;  %v1372_v39 = vor.u32 %v1784_v31, %v1371_v30  ;;  %v1564_v43 = vor.u32 %v1832_v34, %v1563_v33  ;;  %v1503_v30 = vld [vmem:[#allocation7 + $0x1b8] sm:$0xf]  ;;  %v1817_v31 = vld [vmem:[#allocation7 + $0x1c0] sm:$0xf0] }
  0x54   :  { %v1647_v33 = vld [vmem:[#allocation7 + $0x2d8] sm:$0xf]  ;;  %v1853_v34 = vld [vmem:[#allocation7 + $0x2e0] sm:$0xf0] }
  0x55   :  { %944 = vmatpush.bf16.msrb.mxu3 %v1608_v4  ;;  %v1527_v4 = vld [vmem:[#allocation7 + $0x1e8] sm:$0xf]  ;;  %v1648_v41 = vor.u32 %v1853_v34, %v1647_v33  ;;  %v1877_v33 = vld [vmem:[#allocation9 + $0xa0] sm:$0xff] }
  0x56   :  { %920 = vmatpush.bf16.msra.mxu1 %v1392_v35  ;;  %v1528_v14 = vor.u32 %v1823_v5, %v1527_v4  ;;  %v1587_v4 = vld [vmem:[#allocation7 + $0x260] sm:$0xf]  ;;  %v1838_v5 = vld [vmem:[#allocation7 + $0x268] sm:$0xf0] }
  0x57   :  { %907 = vmatpush.bf16.msrb.mxu0 %v1296_v51  ;;  %933 = vmatpush.bf16.msra.mxu2 %v1488_v55  ;;  %v1360_v51 = vor.u32 %v1781_v45, %v1359_v44  ;;  %v1491_v44 = vld [vmem:[#allocation7 + $0x1a0] sm:$0xf]  ;;  %v1814_v45 = vld [vmem:[#allocation7 + $0x1a8] sm:$0xf0] }
  0x59   :  { %945 = vmatpush.bf16.msrb.mxu3 %v1596_v7 }
  0x5a   :  { %921 = vmatpush.bf16.msra.mxu1 %v1380_v47  ;;  %v1551_v47 = vld [vmem:[#allocation7 + $0x218] sm:$0xf] }
  0x5b   :  { %908 = vmatpush.bf16.msrb.mxu0 %v1284_v60  ;;  %934 = vmatpush.bf16.msra.mxu2 %v1476_v0  ;;  %v1552_v54 = vor.u32 %v1829_v48, %v1551_v47  ;;  %v1432_v60 = vor.u32 %v1799_v53, %v1431_v52  ;;  %v112_v0 = vperm.slane %v2097_v11, 3  ;;  %v1515_v11 = vld [vmem:[#allocation7 + $0x1d0] sm:$0xf]  ;;  %v1635_v48 = vld [vmem:[#allocation7 + $0x2c0] sm:$0xf] }
  0x5c   :  { %v1287_v52 = vld [vmem:[#allocation7 + $0x8] sm:$0xf] }
  0x5d   :  { %946 = vmatpush.bf16.msrb.mxu3 %v1584_v10  ;;  %v1793_v10 = vld [vmem:[#allocation7 + $0x100] sm:$0xf0] }
  0x5e   :  { %v1408_v19 = vor.u32 %v1793_v10, %v1407_v9  ;;  %v1864_v9 = vld [vmem:[#allocation9 + $0x38] sm:$0xff]  ;;  %v1863_v10 = vld [vmem:[#allocation9 + $0x30] sm:$0xff] }
  0x61   :  { %947 = vmatpush.bf16.msrb.mxu3 %v1572_v15  ;;  %v1323_v15 = vld [vmem:[#allocation7 + $0x50] sm:$0xf] }
  0x9a   :  { %v163_v17 = vpop.f32.mrf.mxu1 }
  0x9b   :  { %v164_v18 = vadd.f32 %v163_v17, %v110_v16  ;;  %v1772_v16 = vld [vmem:[#allocation7 + $0x58] sm:$0xf0] }
  0x9c   :  { %v1820_v17 = vld [vmem:[#allocation7 + $0x1d8] sm:$0xf0] }
  0x9d   :  { %v194_v22 = vmax.f32 %v164_v18, 0.0  ;;  %v1516_v26 = vor.u32 %v1820_v17, %v1515_v11  ;;  %v1858_v11 = vld [vmem:[#allocation9 + $0x8] sm:$0xff] }
  0x9e   :  { %v1870_v17 = vld [vmem:[#allocation9 + $0x68] sm:$0xff] }
  0x9f   :  { %v2102_v12 = vpack.c.bf16 %v194_v22, %v194_v22  ;;  %v150_v25 = vpop.f32.mrf.mxu3  ;;  %v1395_v22 = vld [vmem:[#allocation7 + $0xe0] sm:$0xf] }
  0xa0   :  { %v151_v28 = vadd.f32 %v150_v25, %v109_v21  ;;  %v1856_v21 = vld [vmem:[#allocation7 + $0x2f8] sm:$0xf0]  ;;  %v1324_v25 = vor.u32 %v1772_v16, %v1323_v15  ;;  %v1859_v15 = vld [vmem:[#allocation9 + $0x10] sm:$0xff] }
  0xa1   :  { %v176_v29 = vpop.f32.mrf.mxu2  ;;  %870 = vmatmul.bf16.vlgmr.msrb.gmra.mxu1 %v2102_v12  ;;  %v1871_v16 = vld [vmem:[#allocation9 + $0x70] sm:$0xff] }
  0xa2   :  { %v177_v32 = vadd.f32 %v176_v29, %v111_v23  ;;  %v193_v35 = vmax.f32 %v151_v28, 0.0  ;;  %966 = vmatpush.bf16.msrb.mxu1 %v1468_v24  ;;  %v165_v37 = vpop.f32.mrf.mxu1  ;;  %v1790_v23 = vld [vmem:[#allocation7 + $0xe8] sm:$0xf0]  ;;  %v1660_v28 = vor.u32 %v1856_v21, %v1659_v20  ;;  %v1769_v29 = vld [vmem:[#allocation7 + $0x40] sm:$0xf0]  ;;  %v1868_v21 = vld [vmem:[#allocation9 + $0x58] sm:$0xff] }
  0xa3   :  { %v1787_v37 = vld [vmem:[#allocation7 + $0xd0] sm:$0xf0] }
  0xa4   :  { %v195_v38 = vmax.f32 %v177_v32, 0.0  ;;  %v2105_v42 = vpack.c.bf16 %v193_v35, %v193_v35  ;;  %v1396_v32 = vor.u32 %v1790_v23, %v1395_v22  ;;  %v1880_v22 = vld [vmem:[#allocation9 + $0xb8] sm:$0xff] }
  0xa6   :  { %v2107_v46 = vpack.c.bf16 %v195_v38, %v195_v38  ;;  %967 = vmatpush.bf16.msrb.mxu1 %v1456_v36  ;;  %857 = vmatmul.bf16.vlgmr.msra.gmra.mxu0 %v2105_v42  ;;  %v1383_v36 = vld [vmem:[#allocation7 + $0xc8] sm:$0xf]  ;;  %v1312_v38 = vor.u32 %v1769_v29, %v1311_v27 }
  0xa7   :  { %v152_v50 = vpop.f32.mrf.mxu3  ;;  %953 = vmatpush.bf16.msra.mxu0 %v1372_v39  ;;  %v1504_v39 = vor.u32 %v1817_v31, %v1503_v30  ;;  %v1384_v47 = vor.u32 %v1787_v37, %v1383_v36  ;;  %v1866_v27 = vld [vmem:[#allocation9 + $0x48] sm:$0xff]  ;;  %v329_v30 = vld [vmem:[%s2136_s4] sm:$0x7]  ;;  %v1876_v36 = vld [vmem:[#allocation9 + $0x98] sm:$0xff] }
  0xa8   :  { %883 = vmatmul.bf16.vlgmr.msrb.gmra.mxu2 %v2107_v46  ;;  %v331_v34 = vperm.slane %v329_v30, 0 }
  0xa9   :  { %979 = vmatpush.bf16.msrb.mxu2 %v1564_v43  ;;  %v178_v55 = vpop.f32.mrf.mxu2  ;;  %v1766_v43 = vld [vmem:[#allocation7 + $0x28] sm:$0xf0] }
  0xaa   :  { %968 = vmatpush.bf16.msrb.mxu1 %v1444_v49  ;;  %v1850_v49 = vld [vmem:[#allocation7 + $0x2c8] sm:$0xf0]  ;;  %v1300_v50 = vor.u32 %v1766_v43, %v1299_v40  ;;  %v1479_v55 = vld [vmem:[#allocation7 + $0x188] sm:$0xf] }
  0xab   :  { %954 = vmatpush.bf16.msra.mxu0 %v1360_v51  ;;  %v1492_v51 = vor.u32 %v1814_v45, %v1491_v44  ;;  %v1636_v53 = vor.u32 %v1850_v49, %v1635_v48 }
  0xad   :  { %980 = vmatpush.bf16.msrb.mxu2 %v1552_v54  ;;  %v1763_v54 = vld [vmem:[#allocation7 + $0x10] sm:$0xf0] }
  0xae   :  { %969 = vmatpush.bf16.msrb.mxu1 %v1432_v60  ;;  %v1288_v59 = vor.u32 %v1763_v54, %v1287_v52  ;;  %v1480_v60 = vor.u32 %v1811_v56, %v1479_v55  ;;  %v1873_v52 = vld [vmem:[#allocation9 + $0x80] sm:$0xff] }
  0xaf   :  { %v189_v7 = vpop.f32.mrf.mxu3  ;;  %955 = vmatpush.bf16.msra.mxu0 %v1348_v61  ;;  %v1624_v61 = vor.u32 %v1847_v58, %v1623_v57 }
  0xb0   :  { %v190_v13 = vadd.f32 %v189_v7, %v112_v0  ;;  %v1612_v0 = vor.u32 %v1844_v63, %v1611_v62  ;;  %v1835_v7 = vld [vmem:[#allocation7 + $0x250] sm:$0xf0] }
  0xb1   :  { %981 = vmatpush.bf16.msrb.mxu2 %v1540_v1  ;;  %922 = vmatmul.bf16.vlgmr.msra.gmra.mxu1 %v2102_v12  ;;  %v1599_v1 = vld [vmem:[#allocation7 + $0x278] sm:$0xf] }
  0xb2   :  { %v196_v18 = vmax.f32 %v190_v13, 0.0  ;;  %970 = vmatpush.bf16.msrb.mxu1 %v1420_v6  ;;  %v1600_v3 = vor.u32 %v1841_v2, %v1599_v1  ;;  %v1575_v6 = vld [vmem:[#allocation7 + $0x248] sm:$0xf]  ;;  %v1860_v13 = vld [vmem:[#allocation9 + $0x18] sm:$0xff] }
  0xb3   :  { %956 = vmatpush.bf16.msra.mxu0 %v1336_v8  ;;  %v1576_v8 = vor.u32 %v1835_v7, %v1575_v6 }
  0xb4   :  { %v2113_v24 = vpack.c.bf16 %v196_v18, %v196_v18  ;;  %v1857_v18 = vld [vmem:[#allocation9] sm:$0xff] }
  0xb5   :  { %982 = vmatpush.bf16.msrb.mxu2 %v1528_v14  ;;  %v1872_v14 = vld [vmem:[#allocation9 + $0x78] sm:$0xff] }
  0xb6   :  { %971 = vmatpush.bf16.msrb.mxu1 %v1408_v19  ;;  %896 = vmatmul.bf16.vlgmr.msra.gmra.mxu3 %v2113_v24  ;;  %v1869_v19 = vld [vmem:[#allocation9 + $0x60] sm:$0xff] }
  0xb7   :  { %909 = vmatmul.bf16.vlgmr.msrb.gmra.mxu0 %v2105_v42  ;;  %v191_v35 = vpop.f32.mrf.mxu3  ;;  %992 = vmatpush.bf16.msra.mxu3 %v1660_v28  ;;  %v1878_v28 = vld [vmem:[#allocation9 + $0xa8] sm:$0xff] }
  0xb8   :  { %935 = vmatmul.bf16.vlgmr.msra.gmra.mxu2 %v2107_v46  ;;  %957 = vmatpush.bf16.msra.mxu0 %v1324_v25  ;;  %v1879_v25 = vld [vmem:[#allocation9 + $0xb0] sm:$0xff] }
  0xb9   :  { %983 = vmatpush.bf16.msrb.mxu2 %v1516_v26 }
  0xba   :  { %972 = vmatpush.bf16.msrb.mxu1 %v1396_v32  ;;  %v1865_v32 = vld [vmem:[#allocation9 + $0x40] sm:$0xff] }
  0xbb   :  { %993 = vmatpush.bf16.msra.mxu3 %v1648_v41 }
  0xbc   :  { %958 = vmatpush.bf16.msra.mxu0 %v1312_v38 }
  0xbd   :  { %984 = vmatpush.bf16.msrb.mxu2 %v1504_v39  ;;  %v1875_v39 = vld [vmem:[#allocation9 + $0x90] sm:$0xff] }
  0xbe   :  { %973 = vmatpush.bf16.msrb.mxu1 %v1384_v47  ;;  %v1874_v47 = vld [vmem:[#allocation9 + $0x88] sm:$0xff] }
  0xbf   :  { %994 = vmatpush.bf16.msra.mxu3 %v1636_v53  ;;  %v332_v53 = vperm.slane %v329_v30, 1 }
  0xc0   :  { %959 = vmatpush.bf16.msra.mxu0 %v1300_v50 }
  0xc1   :  { %985 = vmatpush.bf16.msrb.mxu2 %v1492_v51  ;;  %974 = vmatmul.bf16.vlgmr.msrb.gmra.mxu1 %v2102_v12  ;;  %v1588_v12 = vor.u32 %v1838_v5, %v1587_v4  ;;  %v333_v5 = vperm.slane %v329_v30, 2 }
  0xc2   :  { %1220 = vmatpush.bf16.msra.mxu1 %v1872_v14 }
  0xc3   :  { %995 = vmatpush.bf16.msra.mxu3 %v1624_v61 }
  0xc4   :  { %960 = vmatpush.bf16.msra.mxu0 %v1288_v59 }
  0xc5   :  { %986 = vmatpush.bf16.msrb.mxu2 %v1480_v60 }
  0xc6   :  { %948 = vmatmul.bf16.vlgmr.msrb.gmra.mxu3 %v2113_v24  ;;  %1221 = vmatpush.bf16.msra.mxu1 %v1871_v16 }
  0xc7   :  { %961 = vmatmul.bf16.vlgmr.msra.gmra.mxu0 %v2105_v42  ;;  %996 = vmatpush.bf16.msra.mxu3 %v1612_v0  ;;  %v1862_v42 = vld [vmem:[#allocation9 + $0x28] sm:$0xff] }
  0xc8   :  { %987 = vmatmul.bf16.vlgmr.msrb.gmra.mxu2 %v2107_v46  ;;  %1207 = vmatpush.bf16.msrb.mxu0 %v1864_v9  ;;  %v1861_v46 = vld [vmem:[#allocation9 + $0x20] sm:$0xff] }
  0xc9   :  { %1233 = vmatpush.bf16.msra.mxu2 %v1880_v22 }
  0xca   :  { %1222 = vmatpush.bf16.msra.mxu1 %v1870_v17 }
  0xcb   :  { %997 = vmatpush.bf16.msra.mxu3 %v1600_v3 }
  0xcc   :  { %1208 = vmatpush.bf16.msrb.mxu0 %v1863_v10 }
  0xcd   :  { %1234 = vmatpush.bf16.msra.mxu2 %v1879_v25 }
  0xce   :  { %1223 = vmatpush.bf16.msra.mxu1 %v1869_v19 }
  0xcf   :  { %998 = vmatpush.bf16.msra.mxu3 %v1588_v12 }
  0xd0   :  { %1209 = vmatpush.bf16.msrb.mxu0 %v1862_v42 }
  0xd1   :  { %1235 = vmatpush.bf16.msra.mxu2 %v1878_v28 }
  0xd2   :  { %1224 = vmatpush.bf16.msra.mxu1 %v1868_v21 }
  0xd3   :  { %999 = vmatpush.bf16.msra.mxu3 %v1576_v8 }
  0xd4   :  { %1210 = vmatpush.bf16.msrb.mxu0 %v1861_v46 }
  0xd5   :  { %1236 = vmatpush.bf16.msra.mxu2 %v1877_v33 }
  0xd6   :  { %1000 = vmatmul.bf16.vlgmr.msra.gmra.mxu3 %v2113_v24  ;;  %v1867_v24 = vld [vmem:[#allocation9 + $0x50] sm:$0xff] }
  0xd7   :  { %1225 = vmatpush.bf16.msra.mxu1 %v1867_v24 }
  0xd8   :  { %1211 = vmatpush.bf16.msrb.mxu0 %v1860_v13 }
  0xd9   :  { %1237 = vmatpush.bf16.msra.mxu2 %v1876_v36 }
  0xdb   :  { %1226 = vmatpush.bf16.msra.mxu1 %v1866_v27 }
  0xdc   :  { %1212 = vmatpush.bf16.msrb.mxu0 %v1859_v15 }
  0xdd   :  { %1238 = vmatpush.bf16.msra.mxu2 %v1875_v39 }
  0xdf   :  { %1227 = vmatpush.bf16.msra.mxu1 %v1865_v32 }
  0xe0   :  { %1213 = vmatpush.bf16.msrb.mxu0 %v1858_v11 }
  0xe1   :  { %1239 = vmatpush.bf16.msra.mxu2 %v1874_v47 }
  0xe4   :  { %1214 = vmatpush.bf16.msrb.mxu0 %v1857_v18  ;;  %v1892_v18 = vld [vmem:[%s2138_s6] ss:$0 sm:$0xff] }
  0xe5   :  { %1240 = vmatpush.bf16.msra.mxu2 %v1873_v52 }
 0x11e   :  { %v871_v20 = vpop.f32.mrf.mxu1 }
 0x123   :  { %v858_v23 = vpop.f32.mrf.mxu0 }
 0x124   :  { %v859_v37 = vadd.f32 %v858_v23, %v331_v34 }
 0x126   :  { %v873_v26 = vpop.f32.mrf.mxu1  ;;  %v872_v41 = vadd.f32 %v871_v20, %v859_v37 }
 0x12b   :  { %v884_v29 = vpop.f32.mrf.mxu2  ;;  %v860_v31 = vpop.f32.mrf.mxu0 }
 0x12c   :  { %v885_v44 = vadd.f32 %v884_v29, %v872_v41 }
 0x12e   :  { %v923_v35 = vpop.f32.mrf.mxu1 }
 0x133   :  { %v886_v38 = vpop.f32.mrf.mxu2 }
 0x134   :  { %v910_v40 = vpop.f32.mrf.mxu0 }
 0x135   :  { %v911_v57 = vadd.f32 %v910_v40, %v332_v53 }
 0x136   :  { %v925_v43 = vpop.f32.mrf.mxu1 }
 0x137   :  { %v924_v60 = vadd.f32 %v923_v35, %v911_v57 }
 0x139   :  { %v897_v45 = vpop.f32.mrf.mxu3 }
 0x13a   :  { %v898_v48 = vadd.f32 %v897_v45, %v885_v44 }
 0x13b   :  { %v936_v49 = vpop.f32.mrf.mxu2 }
 0x13c   :  { %v1005_v50 = vmax.f32 %v898_v48, 0.0  ;;  %v912_v51 = vpop.f32.mrf.mxu0  ;;  %v937_v62 = vadd.f32 %v936_v49, %v924_v60 }
 0x13e   :  { %v1008_v54 = vpack.c.bf16 %v1005_v50, %v1005_v50  ;;  %v975_v55 = vpop.f32.mrf.mxu1 }
 0x140   :  { %1215 = vmatmul.bf16.vlgmr.msrb.gmra.mxu0 %v1008_v54 }
 0x141   :  { %v899_v56 = vpop.f32.mrf.mxu3 }
 0x143   :  { %v938_v58 = vpop.f32.mrf.mxu2 }
 0x144   :  { %v962_v59 = vpop.f32.mrf.mxu0 }
 0x145   :  { %v963_v7 = vadd.f32 %v962_v59, %v333_v5 }
 0x146   :  { %v977_v61 = vpop.f32.mrf.mxu1 }
 0x147   :  { %v976_v8 = vadd.f32 %v975_v55, %v963_v7 }
 0x149   :  { %v949_v63 = vpop.f32.mrf.mxu3 }
 0x14a   :  { %v950_v0 = vadd.f32 %v949_v63, %v937_v62 }
 0x14b   :  { %v988_v1 = vpop.f32.mrf.mxu2 }
 0x14c   :  { %v1006_v2 = vmax.f32 %v950_v0, 0.0  ;;  %v964_v3 = vpop.f32.mrf.mxu0  ;;  %v989_v9 = vadd.f32 %v988_v1, %v976_v8 }
 0x14e   :  { %v1009_v4 = vpack.c.bf16 %v1006_v2, %v1006_v2 }
 0x150   :  { %1228 = vmatmul.bf16.vlgmr.msra.gmra.mxu1 %v1009_v4 }
 0x151   :  { %v951_v12 = vpop.f32.mrf.mxu3 }
 0x153   :  { %v990_v6 = vpop.f32.mrf.mxu2 }
 0x159   :  { %v1001_v10 = vpop.f32.mrf.mxu3 }
 0x15a   :  { %v1002_v42 = vadd.f32 %v1001_v10, %v989_v9 }
 0x15c   :  { %v1007_v46 = vmax.f32 %v1002_v42, 0.0 }
 0x15e   :  { %v1010_v13 = vpack.c.bf16 %v1007_v46, %v1007_v46 }
 0x160   :  { %1241 = vmatmul.bf16.vlgmr.msra.gmra.mxu2 %v1010_v13 }
 0x161   :  { %v1003_v14 = vpop.f32.mrf.mxu3 }
 0x1bd   :  { %v1216_v15 = vpop.f32.mrf.mxu0 }
 0x1be   :  { %v1217_v19 = vadd.f32 %v1892_v18, %v1216_v15 }
 0x1c5   :  { %v1218_v16 = vpop.f32.mrf.mxu0 }
 0x1cd   :  { %v1229_v11 = vpop.f32.mrf.mxu1 }
 0x1ce   :  { %v1230_v20 = vadd.f32 %v1229_v11, %v1217_v19 }
 0x1d5   :  { %v1231_v17 = vpop.f32.mrf.mxu1 }
 0x1e3   :  { %v1242_v21 = vpop.f32.mrf.mxu2 }
 0x1e4   :  { %v1243_v22 = vadd.f32 %v1242_v21, %v1230_v20 }
 0x1e6   :  { %1893 = vtanh.f32 %v1243_v22 }
 0x1eb   :  { %v1244_v23 = vpop.f32.mrf.mxu2 }
 0x1ec   :  { %v1894_v24 = vpop.eup %1893 }
 0x1ed   :  { %v1247_v25 = vmul.f32 2.0, %v1894_v24 }
 0x1ef   :  { %1249 = vst.msk [vmem:[%s2139_s7] sm:$0xff] %vm1248_vm1, %v1247_v25 }
 0x1f0   :  { %1254 = vsyncpa [#allocation3], 1 }
 0x1f1   :  { %1255 = vsyncpa [#allocation5], 1 }
 0x1f2   :  { %1256 = vsyncpa [#allocation8], 1 }

</bundles_post_ra>
